<compile_context>
chip_gen: v6e
topology: v6e:2x2x1
jax: 0.10.0
libtpu: 0.0.40
codegen_flags: <defaults>
</compile_context>

<pallas_src>
import math

import jax
import jax.numpy as jnp
from jax import lax
from jax.experimental import pallas as pl
from jax.experimental.pallas import tpu as pltpu


def _round_up(x: int, m: int) -> int:
    return ((x + m - 1) // m) * m


def _linear_relu_kernel(x_ref, w_ref, b_ref, o_ref, acc_ref):
    """One (tm, tn) output tile; K-reduction over grid axis 2.

    x_ref : (tm, tk)   activation tile
    w_ref : (tn, tk)   weight tile, PyTorch (out, in) layout
    b_ref : (1,  tn)   bias tile
    o_ref : (tm, tn)   output tile
    acc_ref: (tm, tn)  f32 accumulator scratch (persists across k steps)
    """
    k = pl.program_id(2)

    @pl.when(k == 0)
    def _():
        acc_ref[...] = jnp.zeros_like(acc_ref)

    # x @ W.T accumulated in f32 on the MXU (contract the K axis of both).
    acc_ref[...] += lax.dot_general(
        x_ref[...],
        w_ref[...],
        dimension_numbers=(((1,), (1,)), ((), ())),
        preferred_element_type=jnp.float32,
    )

    @pl.when(k == pl.num_programs(2) - 1)
    def _():
        y = acc_ref[...] + b_ref[...]          # (tm, tn) + (1, tn)
        o_ref[...] = jnp.maximum(y, 0.0).astype(o_ref.dtype)


def lazy_linear_block(x, weight, bias, *, tm=512, tn=512, tk=512):
    """Forward pass of LazyLinearBlock: relu(x @ weight.T + bias).

    x      : (..., K) float32
    weight : (N, K)   float32   (PyTorch nn.Linear convention: [out, in])
    bias   : (N,)     float32
    returns: (..., N) float32
    """
    *lead, K = x.shape
    N = weight.shape[0]
    M = math.prod(lead) if lead else 1

    # Clamp tiles to the (alignment-rounded) problem size, keeping
    # (8, 128) divisibility: tm % 8 == 0, tn % 128 == 0, tk % 128 == 0.
    tm = min(tm, _round_up(M, 8))
    tn = min(tn, _round_up(N, 128))
    tk = min(tk, _round_up(K, 128))

    Mp = _round_up(M, tm)
    Np = _round_up(N, tn)
    Kp = _round_up(K, tk)

    x2d = x.reshape(M, K)
    if (Mp, Kp) != (M, K):
        x2d = jnp.pad(x2d, ((0, Mp - M), (0, Kp - K)))

    w = weight
    if (Np, Kp) != (N, K):
        w = jnp.pad(w, ((0, Np - N), (0, Kp - K)))

    b2d = bias.reshape(1, N)
    if Np != N:
        b2d = jnp.pad(b2d, ((0, 0), (0, Np - N)))

    grid = (Mp // tm, Np // tn, Kp // tk)

    cost = pl.CostEstimate(
        flops=2 * Mp * Np * Kp,
        transcendentals=0,
        bytes_accessed=4 * (Mp * Kp + Np * Kp + Mp * Np + Np),
    )

    out2d = pl.pallas_call(
        _linear_relu_kernel,
        out_shape=jax.ShapeDtypeStruct((Mp, Np), x.dtype),
        grid_spec=pltpu.PrefetchScalarGridSpec(
            num_scalar_prefetch=0,
            grid=grid,
            in_specs=[
                pl.BlockSpec((tm, tk), lambda i, j, k: (i, k)),   # x tile
                pl.BlockSpec((tn, tk), lambda i, j, k: (j, k)),   # weight tile
                pl.BlockSpec((1, tn), lambda i, j, k: (0, j)),    # bias tile
            ],
            out_specs=pl.BlockSpec((tm, tn), lambda i, j, k: (i, j)),
            scratch_shapes=[pltpu.VMEM((tm, tn), jnp.float32)],
        ),
        compiler_params=pltpu.CompilerParams(
            dimension_semantics=("parallel", "parallel", "arbitrary"),
            # 48 MiB: comfortably above the ~8 MiB double-buffered working set
            # at 512 tiles, yet safe on v7x's 64 MiB physical VMEM per core.
            vmem_limit_bytes=48 << 20,
        ),
        cost_estimate=cost,
    )(x2d, w, b2d)

    out2d = out2d[:M, :N]
    return out2d.reshape(*lead, N)


if __name__ == "__main__":
    key = jax.random.PRNGKey(0)
    kx, kw, kb = jax.random.split(key, 3)

    batch, seq, in_features = 2, 8, 32
    out_features = 16

    x = jax.random.normal(kx, (batch, seq, in_features), dtype=jnp.float32)
    # Deterministic parameter init (nn.Linear-like uniform fan-in scaling).
    bound = 1.0 / jnp.sqrt(jnp.float32(in_features))
    weight = jax.random.uniform(
        kw, (out_features, in_features), dtype=jnp.float32,
        minval=-bound, maxval=bound)
    bias = jax.random.uniform(
        kb, (out_features,), dtype=jnp.float32, minval=-bound, maxval=bound)

    out = lazy_linear_block(x, weight, bias)
    out = jax.block_until_ready(out)

    # Reference check in plain JAX.
    ref = jnp.maximum(jnp.einsum("bsk,nk->bsn", x, weight) + bias, 0.0)
    assert out.shape == (batch, seq, out_features)
    assert jnp.allclose(out, ref, atol=1e-5, rtol=1e-5)

    print("KERNEL_OK")
</pallas_src>

<mosaic_0001>
module attributes {stable_mosaic.version = 11 : i64} {
  func.func @_linear_relu_kernel(%arg0: i32, %arg1: i32, %arg2: i32, %arg3: memref<16x128xf32, #tpu.memory_space<vmem>>, %arg4: memref<128x128xf32, #tpu.memory_space<vmem>>, %arg5: memref<1x128xf32, #tpu.memory_space<vmem>>, %arg6: memref<16x128xf32, #tpu.memory_space<vmem>>, %arg7: memref<16x128xf32, #tpu.memory_space<vmem>>) attributes {dimension_semantics = [#tpu.dimension_semantics<parallel>, #tpu.dimension_semantics<parallel>, #tpu.dimension_semantics<arbitrary>], iteration_bounds = array<i64: 1, 1, 1>, scalar_prefetch = 0 : i64, scratch_operands = 1 : i64, tpu.core_type = #tpu.core_type<tc>, window_params = [{transform_indices = @transform_0, window_bounds = array<i64: 16, 128>}, {transform_indices = @transform_1, window_bounds = array<i64: 128, 128>}, {transform_indices = @transform_2, window_bounds = array<i64: 1, 128>}, {transform_indices = @transform_3, window_bounds = array<i64: 16, 128>}]} {
    %c0_i32 = arith.constant 0 : i32
    %0 = arith.cmpi eq, %arg2, %c0_i32 : i32
    %1 = arith.extui %0 : i1 to i32
    %c0_i32_0 = arith.constant 0 : i32
    %2 = arith.cmpi ne, %1, %c0_i32_0 : i32
    scf.if %2 {
      %cst_10 = arith.constant 0.000000e+00 : f32
      %12 = vector.broadcast %cst_10 : f32 to vector<16x128xf32>
      %c0_11 = arith.constant 0 : index
      %c0_12 = arith.constant 0 : index
      %13 = vector.load %arg7[%c0_11, %c0_12] : memref<16x128xf32, #tpu.memory_space<vmem>>, vector<16x128xf32>
      tpu.vector_store %arg7[%c0_11, %c0_12], %12 {strides = array<i32>} : memref<16x128xf32, #tpu.memory_space<vmem>>, vector<16x128xf32>,
    } else {
    }
    %c0 = arith.constant 0 : index
    %c0_1 = arith.constant 0 : index
    %3 = vector.load %arg7[%c0, %c0_1] : memref<16x128xf32, #tpu.memory_space<vmem>>, vector<16x128xf32>
    %c0_2 = arith.constant 0 : index
    %c0_3 = arith.constant 0 : index
    %4 = vector.load %arg3[%c0_2, %c0_3] : memref<16x128xf32, #tpu.memory_space<vmem>>, vector<16x128xf32>
    %c0_4 = arith.constant 0 : index
    %c0_5 = arith.constant 0 : index
    %5 = vector.load %arg4[%c0_4, %c0_5] : memref<128x128xf32, #tpu.memory_space<vmem>>, vector<128x128xf32>
    %cst = arith.constant dense<0.000000e+00> : vector<16x128xf32>
    %6 = tpu.matmul %4, %5, %cst {dimension_numbers = #tpu.dot_dimension_numbers<[1], [1], [0], [0], [0, 0, 1, 0], [], []>} : vector<16x128xf32>, vector<128x128xf32>, vector<16x128xf32> -> vector<16x128xf32>
    %7 = arith.addf %3, %6 : vector<16x128xf32>
    %c0_6 = arith.constant 0 : index
    %c0_7 = arith.constant 0 : index
    %8 = vector.load %arg7[%c0_6, %c0_7] : memref<16x128xf32, #tpu.memory_space<vmem>>, vector<16x128xf32>
    tpu.vector_store %arg7[%c0_6, %c0_7], %7 {strides = array<i32>} : memref<16x128xf32, #tpu.memory_space<vmem>>, vector<16x128xf32>,
    %c0_i32_8 = arith.constant 0 : i32
    %9 = arith.cmpi eq, %arg2, %c0_i32_8 : i32
    %10 = arith.extui %9 : i1 to i32
    %c0_i32_9 = arith.constant 0 : i32
    %11 = arith.cmpi ne, %10, %c0_i32_9 : i32
    scf.if %11 {
      %c0_10 = arith.constant 0 : index
      %c0_11 = arith.constant 0 : index
      %12 = vector.load %arg7[%c0_10, %c0_11] : memref<16x128xf32, #tpu.memory_space<vmem>>, vector<16x128xf32>
      %c0_12 = arith.constant 0 : index
      %c0_13 = arith.constant 0 : index
      %13 = vector.load %arg5[%c0_12, %c0_13] : memref<1x128xf32, #tpu.memory_space<vmem>>, vector<1x128xf32>
      %14 = vector.broadcast %13 : vector<1x128xf32> to vector<16x128xf32>
      %15 = arith.addf %12, %14 : vector<16x128xf32>
      %cst_14 = arith.constant 0.000000e+00 : f32
      %16 = vector.broadcast %cst_14 : f32 to vector<16x128xf32>
      %17 = arith.maximumf %15, %16 : vector<16x128xf32>
      %c0_15 = arith.constant 0 : index
      %c0_16 = arith.constant 0 : index
      %18 = vector.load %arg6[%c0_15, %c0_16] : memref<16x128xf32, #tpu.memory_space<vmem>>, vector<16x128xf32>
      tpu.vector_store %arg6[%c0_15, %c0_16], %17 {strides = array<i32>} : memref<16x128xf32, #tpu.memory_space<vmem>>, vector<16x128xf32>,
    } else {
    }
    return
  }
  func.func @transform_0(%arg0: i32, %arg1: i32, %arg2: i32) -> (i32, i32) {
    %c0_i32 = arith.constant 0 : i32
    return %arg0, %arg2 : i32, i32
  }
  func.func @transform_1(%arg0: i32, %arg1: i32, %arg2: i32) -> (i32, i32) {
    %c0_i32 = arith.constant 0 : i32
    return %arg1, %arg2 : i32, i32
  }
  func.func @transform_2(%arg0: i32, %arg1: i32, %arg2: i32) -> (i32, i32) {
    %c0_i32 = arith.constant 0 : i32
    %c0_i32_0 = arith.constant 0 : i32
    return %c0_i32, %arg1 : i32, i32
  }
  func.func @transform_3(%arg0: i32, %arg1: i32, %arg2: i32) -> (i32, i32) {
    %c0_i32 = arith.constant 0 : i32
    return %arg0, %arg1 : i32, i32
  }
}

</mosaic_0001>

<bundles_post_ra>
// kernel: tpu_custom_call.1
= control target key start
LH: loop header
LB: loop body
LE: loop exit
PB: predicated region body
PF: predicated region fallthrough
CT: control target
= control target key end

     0   :  { %8 = vsyncpa [#allocation4], 0  ;;  %s355_s0 = inlined_call_operand.hbm [shape: f32[16,128], index: 0, kind: input, shape index: {}]   ;;  %s356_s1 = inlined_call_operand.hbm [shape: f32[128,128], index: 1, kind: input, shape index: {}]   ;;  %s357_s2 = inlined_call_operand.vmem [shape: f32[1,128], index: 2, kind: input, shape index: {}]   ;;  %s358_s3 = inlined_call_operand.hbm [shape: f32[16,128], index: 3, kind: output, shape index: {}]  }
   0x1   :  { %9 = vsyncpa [#allocation7], 0 }
   0x2   :  { %10 = vsyncpa [#allocation5], 0  ;;  %s309_s12 = smov [#allocation3]  }
   0x3   :  { %s16_s13 = sshll.u32 %s309_s12, 4  ;;  %s17_s13 = int_to_ptr.vmem [resolvable:$true] %s16_s13 }
   0x4   :  { %s251_s14 = scalar_lea.vmem %s17_s13, 256  ;;  %p256_p1 = scmp.lt.s32.totalorder %s17_s13, %s17_s13 }
   0x5   :  { %p252_p0 = scmp.ne.s32.totalorder %s17_s13, %s251_s14  ;;  %p257_p2 = scmp.lt.s32.totalorder %s251_s14, %s251_s14 }
   0x7   :  { %p258_p3 = por %p257_p2, %p256_p1 }
   0x9   :  { %p259_p4 = pnand %p258_p3, %p252_p0 }
   0xb   :  { %262 = shalt.err (!%p259_p4)
}
   0xc   :  { %s310_s15 = smov 128   ;;  %s311_s16 = smov 8  }
   0xd   :  { %22 = dma.hbm_to_vmem [thread:$0]  %s355_s0, 256, %s17_s13, [#allocation4], %s310_s15, %s310_s15, %s311_s16  }
   0xe   :  { %s312_s19 = smov [#allocation6]  }
   0xf   :  { %s28_s20 = sshll.u32 %s312_s19, 4  ;;  %s29_s20 = int_to_ptr.vmem [resolvable:$true] %s28_s20 }
  0x10   :  { %s271_s21 = scalar_lea.vmem %s29_s20, 2048  ;;  %p276_p6 = scmp.lt.s32.totalorder %s29_s20, %s29_s20 }
  0x11   :  { %p272_p5 = scmp.ne.s32.totalorder %s29_s20, %s271_s21  ;;  %p277_p7 = scmp.lt.s32.totalorder %s271_s21, %s271_s21 }
  0x13   :  { %p278_p8 = por %p277_p7, %p276_p6 }
  0x15   :  { %p279_p9 = pnand %p278_p8, %p272_p5 }
  0x17   :  { %282 = shalt.err (!%p279_p9)
}
  0x18   :  { %34 = dma.hbm_to_vmem [thread:$0]  %s356_s1, 2048, %s29_s20, [#allocation7], %s310_s15, %s310_s15, %s311_s16  }
  0x19   :  { %303 = dma.done.wait [#allocation4], 256  }
  0x1a   :  { %304 = vsyncadd [#allocation4], 4294967040 }
  0x1b   :  { %305 = dma.done.wait [#allocation7], 2048  }
  0x1c   :  { %306 = vsyncadd [#allocation7], 4294965248  ;;  %v68_v0 = vld [vmem:[#allocation6 + $0x78] sm:$0xff]  ;;  %v67_v1 = vld [vmem:[#allocation6 + $0x70] sm:$0xff]  ;;  %s313_s24 = smov [#allocation8]  }
  0x1d   :  { %203 = vmatprep.subr.mxu0 %v68_v0  ;;  %v66_v2 = vld [vmem:[#allocation6 + $0x68] sm:$0xff]  ;;  %v51_v3 = vld [vmem:[#allocation3] sm:$0xff]  ;;  %v65_v4 = vld [vmem:[#allocation6 + $0x60] sm:$0xff]  ;;  %s171_s25 = sshll.u32 %s313_s24, 4  ;;  %s172_s25 = int_to_ptr.vmem [resolvable:$true] %s171_s25 }
  0x1e   :  { %204 = vmatpush3.xpose.msra.mxu0 %v68_v0  ;;  %235 = vmatprep.mubr.f32.mxu0 %v51_v3  ;;  %v64_v5 = vld [vmem:[#allocation6 + $0x58] sm:$0xff]  ;;  %v63_v6 = vld [vmem:[#allocation6 + $0x50] sm:$0xff]  ;;  %v62_v7 = vld [vmem:[#allocation6 + $0x48] sm:$0xff]  ;;  %s283_s26 = scalar_lea.vmem %s172_s25, 256  ;;  %p288_p11 = scmp.lt.s32.totalorder %s172_s25, %s172_s25 }
  0x1f   :  { %205 = vmatprep.subr.mxu0 %v67_v1  ;;  %v61_v8 = vld [vmem:[#allocation6 + $0x40] sm:$0xff]  ;;  %v60_v9 = vld [vmem:[#allocation6 + $0x38] sm:$0xff]  ;;  %v59_v10 = vld [vmem:[#allocation6 + $0x30] sm:$0xff]  ;;  %p284_p10 = scmp.ne.s32.totalorder %s172_s25, %s283_s26  ;;  %p289_p12 = scmp.lt.s32.totalorder %s283_s26, %s283_s26 }
  0x20   :  { %v58_v11 = vld [vmem:[#allocation6 + $0x28] sm:$0xff]  ;;  %v57_v12 = vld [vmem:[#allocation6 + $0x20] sm:$0xff]  ;;  %v56_v13 = vld [vmem:[#allocation6 + $0x18] sm:$0xff] }
  0x21   :  { %v55_v14 = vld [vmem:[#allocation6 + $0x10] sm:$0xff]  ;;  %v54_v15 = vld [vmem:[#allocation6 + $0x8] sm:$0xff]  ;;  %v53_v16 = vld [vmem:[#allocation6] sm:$0xff]  ;;  %p290_p13 = por %p289_p12, %p288_p11 }
  0x22   :  { %206 = vmatpush3.xpose.msra.mxu0 %v67_v1  ;;  %v52_v17 = vld [vmem:[#allocation3 + $0x8] sm:$0xff]  ;;  %v184_v18 = vld [vmem:[%s357_s2] ss:$0 sm:$0xff] }
  0x23   :  { %207 = vmatprep.subr.mxu0 %v66_v2  ;;  %p291_p0 = pnand %p290_p13, %p284_p10 }
  0x26   :  { %208 = vmatpush3.xpose.msra.mxu0 %v66_v2 }
  0x27   :  { %209 = vmatprep.subr.mxu0 %v65_v4 }
  0x2a   :  { %210 = vmatpush3.xpose.msra.mxu0 %v65_v4 }
  0x2b   :  { %211 = vmatprep.subr.mxu0 %v64_v5 }
  0x2e   :  { %212 = vmatpush3.xpose.msra.mxu0 %v64_v5 }
  0x2f   :  { %213 = vmatprep.subr.mxu0 %v63_v6 }
  0x32   :  { %214 = vmatpush3.xpose.msra.mxu0 %v63_v6 }
  0x33   :  { %215 = vmatprep.subr.mxu0 %v62_v7 }
  0x36   :  { %216 = vmatpush3.xpose.msra.mxu0 %v62_v7 }
  0x37   :  { %217 = vmatprep.subr.mxu0 %v61_v8 }
  0x3a   :  { %218 = vmatpush3.xpose.msra.mxu0 %v61_v8 }
  0x3b   :  { %219 = vmatprep.subr.mxu0 %v60_v9 }
  0x3e   :  { %220 = vmatpush3.xpose.msra.mxu0 %v60_v9 }
  0x3f   :  { %221 = vmatprep.subr.mxu0 %v59_v10 }
  0x42   :  { %222 = vmatpush3.xpose.msra.mxu0 %v59_v10 }
  0x43   :  { %223 = vmatprep.subr.mxu0 %v58_v11 }
  0x46   :  { %224 = vmatpush3.xpose.msra.mxu0 %v58_v11 }
  0x47   :  { %225 = vmatprep.subr.mxu0 %v57_v12 }
  0x4a   :  { %226 = vmatpush3.xpose.msra.mxu0 %v57_v12 }
  0x4b   :  { %227 = vmatprep.subr.mxu0 %v56_v13 }
  0x4e   :  { %228 = vmatpush3.xpose.msra.mxu0 %v56_v13 }
  0x4f   :  { %229 = vmatprep.subr.mxu0 %v55_v14 }
  0x52   :  { %230 = vmatpush3.xpose.msra.mxu0 %v55_v14 }
  0x53   :  { %231 = vmatprep.subr.mxu0 %v54_v15 }
  0x56   :  { %232 = vmatpush3.xpose.msra.mxu0 %v54_v15 }
  0x57   :  { %233 = vmatprep.subr.mxu0 %v53_v16 }
  0x5a   :  { %234 = vmatpush3.xpose.msra.mxu0 %v53_v16 }
  0x5d   :  { %236 = vmatmul.mubr.f32.vlgmr.msra.gmra.mxu0 %v52_v17 }
 0x11d   :  { %v237_v19 = vpop.f32.mrf.mxu0 }
 0x11e   :  { %v161_v20 = vadd.f32 %v237_v19, %v184_v18 }
 0x11f   :  { %v135_v21 = vpop.f32.mrf.mxu0 }
 0x120   :  { %v163_v22 = vmax.f32 %v161_v20, 0.0  ;;  %v160_v23 = vadd.f32 %v184_v18, %v135_v21 }
 0x122   :  { %165 = vst [vmem:[#allocation8 + $0x8] sm:$0xff] %v163_v22  ;;  %v162_v24 = vmax.f32 %v160_v23, 0.0 }
 0x124   :  { %164 = vst [vmem:[#allocation8] sm:$0xff] %v162_v24 }
 0x125   :  { %294 = shalt.err (!%p291_p0)
}
 0x126   :  { %177 = dma.vmem_to_hbm [thread:$0]  %s172_s25, 256, %s358_s3, [#allocation5], %s310_s15, %s310_s15, %s311_s16  }
 0x127   :  { %307 = dma.done.wait [#allocation5], 256  }
 0x128   :  { %308 = vsyncadd [#allocation5], 4294967040 }
 0x129   :  { %181 = vsyncpa [#allocation4], 1 }
 0x12a   :  { %182 = vsyncpa [#allocation7], 1 }
 0x12b   :  { %183 = vsyncpa [#allocation5], 1 }

</bundles_post_ra>
